<compile_context>
chip_gen: v5e
topology: v5e:2x2
jax: 0.10.0
libtpu: 0.0.40
codegen_flags: <defaults>
</compile_context>

<pallas_src>
import functools

import jax
import jax.numpy as jnp
import numpy as np
from jax import lax
from jax.experimental import pallas as pl
from jax.experimental.pallas import tpu as pltpu

# Model hyper-parameters (mirrors bigram.py; vocab_size like tinyshakespeare).
BLOCK_SIZE = 8
N_EMBD = 32
VOCAB_SIZE = 65

VPAD = ((VOCAB_SIZE + 127) // 128) * 128   # lane-aligned vocab width (= 128)
NEG_INF = -1e30                            # fill for padded vocab lanes


# ----------------------------------------------------------------------------
# Tiling helpers
# ----------------------------------------------------------------------------
def _pick_rows_per_tile(B, T, max_rows=4096):
    """Rows per grid tile: bm*T with bm | B (tiles hold whole sequences, so the
    position term is a static tile) and bm*T a multiple of 8 (sublane rule).

    Prefers the largest such tile <= max_rows (amortizes ~0.35 us/step grid
    overhead).  If none fits, falls back to the *smallest* legal tile (bounded
    VMEM) rather than the full B*T slab, unless the full slab itself is small.
    """
    BT = B * T
    legal = [bm * T for bm in range(1, B + 1)
             if B % bm == 0 and (bm * T) % 8 == 0]
    fitting = [tm for tm in legal if tm <= max_rows]
    if fitting:
        return max(fitting)
    if BT <= max_rows:
        return BT
    if legal:
        return min(legal)
    return BT  # TODO(synk): pad B*T rows to a multiple of 8 instead of a full-slab block.


def _vmem_limit_bytes(TM, logit_bytes):
    """Explicit scoped-VMEM request: double-buffered per-step blocks (logits
    tile + idx/tgt tiles + partials) + resident tables + elementwise temps,
    clamped to [32 MiB, 64 MiB] so it fits every generation incl. v7x (64 MiB/TC)."""
    per_step = TM * VPAD * logit_bytes + 2 * TM * 4 + 8 * 128 * 4
    tables = (VPAD * VPAD + BLOCK_SIZE * VPAD) * 4
    temps = 3 * TM * VPAD * 4            # iota / one-hot / f32 logits value
    est = 2 * (per_step + tables) + temps + (1 << 20)
    return int(min(64 << 20, max(32 << 20, est)))


# ----------------------------------------------------------------------------
# Kernel bodies
# ----------------------------------------------------------------------------
def _tile_logits(idx_ref, fused_ref, pos_ref, T, bm):
    """Single fused MXU lookup: one_hot(idx) @ fused_head + pos term.

    idx_ref: (TM, 1) int32; fused_ref: (VPAD, VPAD) f32; pos_ref: (BLOCK, VPAD) f32.
    Returns f32 (TM, VPAD) logits and the lane iota (reused for the target pick).
    """
    TM = idx_ref.shape[0]
    V = fused_ref.shape[0]
    iota = lax.broadcasted_iota(jnp.int32, (TM, V), 1)
    onehot = (idx_ref[...] == iota).astype(jnp.float32)              # exact lookup
    logits = jnp.dot(onehot, fused_ref[...],
                     preferred_element_type=jnp.float32)             # (TM, VPAD)
    # Flat row i has position i % T and tiles start at multiples of T, so the
    # per-tile position term is a static tile of pos_logits[:T].
    logits = logits + jnp.tile(pos_ref[:T, :], (bm, 1))
    return logits, iota


def _tile_nll_sum(logits, iota, tgt):
    """Per-tile sum of cross-entropy NLL (f32, in-register). Padded lanes carry
    ~-1e30 so max / exp ignore them.  Returns shape (1, 1)."""
    m = jnp.max(logits, axis=-1, keepdims=True)
    lse = m + jnp.log(jnp.sum(jnp.exp(logits - m), axis=-1, keepdims=True))
    # No separate f32 one-hot temp (fewer stores / VALU ops; matters most on v5e).
    tgt_logit = jnp.sum(jnp.where(iota == tgt, logits, 0.0), axis=-1, keepdims=True)
    return jnp.sum(lse - tgt_logit, axis=0, keepdims=True)           # (1, 1)


def bigram_logits_kernel(idx_ref, fused_ref, pos_ref, logits_ref, *, T, bm):
    logits, _ = _tile_logits(idx_ref, fused_ref, pos_ref, T, bm)
    logits_ref[...] = logits.astype(logits_ref.dtype)


def bigram_logits_loss_kernel(idx_ref, tgt_ref, fused_ref, pos_ref,
                              logits_ref, part_ref, *, T, bm):
    logits, iota = _tile_logits(idx_ref, fused_ref, pos_ref, T, bm)
    logits_ref[...] = logits.astype(logits_ref.dtype)
    part_ref[...] = jnp.broadcast_to(
        _tile_nll_sum(logits, iota, tgt_ref[...]), (8, 128))


def bigram_loss_kernel(idx_ref, tgt_ref, fused_ref, pos_ref, part_ref, *, T, bm):
    # Loss-only path: no logits writeback at all (kernel was HBM-store bound on it).
    logits, iota = _tile_logits(idx_ref, fused_ref, pos_ref, T, bm)
    part_ref[...] = jnp.broadcast_to(
        _tile_nll_sum(logits, iota, tgt_ref[...]), (8, 128))


# ----------------------------------------------------------------------------
# Parameters
# ----------------------------------------------------------------------------
def init_params(key):
    k_tok, k_pos, k_w, k_b = jax.random.split(key, 4)
    # nn.Embedding default init: N(0, 1)
    tok_tab = jax.random.normal(k_tok, (VOCAB_SIZE, N_EMBD), jnp.float32)
    pos_tab = jax.random.normal(k_pos, (BLOCK_SIZE, N_EMBD), jnp.float32)
    # nn.Linear default init: U(-1/sqrt(in), 1/sqrt(in))
    bound = 1.0 / np.sqrt(N_EMBD)
    w = jax.random.uniform(k_w, (VOCAB_SIZE, N_EMBD), jnp.float32, -bound, bound)
    b = jax.random.uniform(k_b, (VOCAB_SIZE,), jnp.float32, -bound, bound)
    return {"tok_tab": tok_tab, "pos_tab": pos_tab, "w": w, "b": b}


def prepare_params(params):
    """One-time head fusion + lane padding (done once, not per forward call):
        fused_head[v, :] = tok_tab[v] @ W.T + b    (logits contribution of token v)
        pos_logits[t, :] = pos_tab[t] @ W.T        (additive position term)
    Padded vocab lanes [VOCAB_SIZE:VPAD) are filled with -1e30 (so the loss's
    max / log-sum-exp ignore them); padded fused rows are never selected."""
    tok, pos, w, b = params["tok_tab"], params["pos_tab"], params["w"], params["b"]
    fused = tok @ w.T + b[None, :]                                    # (V, V)
    fused_pad = jnp.full((VPAD, VPAD), NEG_INF, jnp.float32)
    fused_pad = fused_pad.at[:VOCAB_SIZE, :VOCAB_SIZE].set(fused)
    pos_head = pos @ w.T                                              # (BLOCK, V)
    pos_pad = jnp.zeros((BLOCK_SIZE, VPAD), jnp.float32)
    pos_pad = pos_pad.at[:, :VOCAB_SIZE].set(pos_head)
    return {"fused_head": fused_pad, "pos_logits": pos_pad}


# ----------------------------------------------------------------------------
# Forward wrapper (matches the PyTorch forward: returns (logits, loss))
# ----------------------------------------------------------------------------
def bigram_forward(prepared, idx, targets=None, *, return_logits=True,
                   pad_logits=False, logits_dtype=jnp.float32, max_rows=4096):
    """Returns (logits, loss).

    pad_logits=False  -> logits shape (B, T, VOCAB_SIZE) (extra slice copy).
    pad_logits=True   -> lane-dense (B, T, VPAD) slab, zero extra HBM traffic;
                         lanes [VOCAB_SIZE:VPAD) hold ~-1e30 (callers must mask).
    return_logits=False (with targets) -> loss-only kernel, no logits writeback.
    logits_dtype=bf16 halves the logits writeback; loss math stays f32.
    """
    B, T = idx.shape
    BT = B * T
    TM = _pick_rows_per_tile(B, T, max_rows)
    bm = TM // T
    n_tiles = BT // TM

    idx_flat = idx.reshape(BT, 1).astype(jnp.int32)

    resident = lambda shape: pl.BlockSpec(shape, lambda i: (0,) * len(shape))
    table_specs = [resident((VPAD, VPAD)),        # fused head (64 KiB)
                   resident((BLOCK_SIZE, VPAD))]  # position logits (4 KiB)
    table_args = (prepared["fused_head"], prepared["pos_logits"])
    row_spec = pl.BlockSpec((TM, 1), lambda i: (i, 0))
    logits_spec = pl.BlockSpec((TM, VPAD), lambda i: (i, 0))
    part_spec = pl.BlockSpec((8, 128), lambda i: (i, 0))

    logit_bytes = np.dtype(logits_dtype).itemsize
    cparams = pltpu.CompilerParams(
        dimension_semantics=("parallel",),   # no revisited outputs -> 2-TC on v7x
        vmem_limit_bytes=_vmem_limit_bytes(TM, logit_bytes))

    def finish_logits(logits_pad_2d):
        # (BT, VPAD) -> (B, T, VPAD) is a free major-dim split (no HBM copy).
        logits3 = logits_pad_2d.reshape(B, T, VPAD)
        if pad_logits:
            return logits3
        return logits3[..., :VOCAB_SIZE]

    if targets is None:
        logits_pad = pl.pallas_call(
            functools.partial(bigram_logits_kernel, T=T, bm=bm),
            out_shape=jax.ShapeDtypeStruct((BT, VPAD), logits_dtype),
            grid=(n_tiles,),
            in_specs=[row_spec] + table_specs,
            out_specs=logits_spec,
            compiler_params=cparams,
        )(idx_flat, *table_args)
        return finish_logits(logits_pad), None

    tgt_flat = targets.reshape(BT, 1).astype(jnp.int32)
    part_shape = jax.ShapeDtypeStruct((n_tiles * 8, 128), jnp.float32)

    if not return_logits:
        partials = pl.pallas_call(
            functools.partial(bigram_loss_kernel, T=T, bm=bm),
            out_shape=part_shape,
            grid=(n_tiles,),
            in_specs=[row_spec, row_spec] + table_specs,
            out_specs=part_spec,
            compiler_params=cparams,
        )(idx_flat, tgt_flat, *table_args)
        loss = jnp.sum(partials[::8, 0]) * (1.0 / BT)
        return None, loss

    logits_pad, partials = pl.pallas_call(
        functools.partial(bigram_logits_loss_kernel, T=T, bm=bm),
        out_shape=(jax.ShapeDtypeStruct((BT, VPAD), logits_dtype), part_shape),
        grid=(n_tiles,),
        in_specs=[row_spec, row_spec] + table_specs,
        out_specs=(logits_spec, part_spec),
        compiler_params=cparams,
    )(idx_flat, tgt_flat, *table_args)
    loss = jnp.sum(partials[::8, 0]) * (1.0 / BT)
    return finish_logits(logits_pad), loss


# ----------------------------------------------------------------------------
# Pure-JAX reference (mirrors the PyTorch module)
# ----------------------------------------------------------------------------
def _reference_forward(params, idx, targets=None):
    B, T = idx.shape
    tok_emb = params["tok_tab"][idx]                    # (B, T, E)
    pos_emb = params["pos_tab"][jnp.arange(T)]          # (T, E)
    x = tok_emb + pos_emb[None]
    logits = x @ params["w"].T + params["b"]            # (B, T, V)
    if targets is None:
        return logits, None
    lf = logits.reshape(B * T, VOCAB_SIZE)
    tf = targets.reshape(B * T)
    logz = jax.scipy.special.logsumexp(lf, axis=-1)
    nll = logz - lf[jnp.arange(B * T), tf]
    return logits, jnp.mean(nll)


if __name__ == "__main__":
    key = jax.random.PRNGKey(0)
    k_params, k_idx, k_tgt = jax.random.split(key, 3)

    params = init_params(k_params)
    prepared = prepare_params(params)          # head fusion + vocab padding, once

    B, T = 2, BLOCK_SIZE                       # batch=2, seq=8
    idx = jax.random.randint(k_idx, (B, T), 0, VOCAB_SIZE, dtype=jnp.int32)
    targets = jax.random.randint(k_tgt, (B, T), 0, VOCAB_SIZE, dtype=jnp.int32)

    # 1) logits only (targets=None), exact (B, T, V) semantics
    logits, loss_none = bigram_forward(prepared, idx)
    # 2) logits + cross-entropy loss
    logits2, loss = bigram_forward(prepared, idx, targets)
    # 3) loss-only training path (no logits writeback)
    _, loss_only = bigram_forward(prepared, idx, targets, return_logits=False)
    # 4) padded lane-dense slab (no wrapper slice copy)
    logits_slab, _ = bigram_forward(prepared, idx, pad_logits=True)
    # 5) bf16 logits writeback (loss math stays f32)
    logits_bf16, _ = bigram_forward(prepared, idx, logits_dtype=jnp.bfloat16)
    jax.block_until_ready((logits, logits2, loss, loss_only, logits_slab, logits_bf16))

    assert loss_none is None
    assert logits.shape == (B, T, VOCAB_SIZE)
    assert logits_slab.shape == (B, T, VPAD)
    assert logits_bf16.dtype == jnp.bfloat16

    ref_logits, ref_loss = _reference_forward(params, idx, targets)
    np.testing.assert_allclose(np.asarray(logits), np.asarray(ref_logits),
                               rtol=2e-5, atol=2e-5)
    np.testing.assert_allclose(np.asarray(logits2), np.asarray(ref_logits),
                               rtol=2e-5, atol=2e-5)
    np.testing.assert_allclose(np.asarray(logits_slab[..., :VOCAB_SIZE]),
                               np.asarray(ref_logits), rtol=2e-5, atol=2e-5)
    np.testing.assert_allclose(np.asarray(logits_bf16.astype(jnp.float32)),
                               np.asarray(ref_logits), rtol=2e-2, atol=5e-2)
    np.testing.assert_allclose(np.asarray(loss), np.asarray(ref_loss),
                               rtol=2e-5, atol=2e-5)
    np.testing.assert_allclose(np.asarray(loss_only), np.asarray(ref_loss),
                               rtol=2e-5, atol=2e-5)

    print("KERNEL_OK")
</pallas_src>

<mosaic_0001>
module attributes {stable_mosaic.version = 11 : i64} {
  func.func @bigram_logits_kernel(%arg0: i32, %arg1: memref<16x1xi32, #tpu.memory_space<vmem>>, %arg2: memref<128x128xf32, #tpu.memory_space<vmem>>, %arg3: memref<8x128xf32, #tpu.memory_space<vmem>>, %arg4: memref<16x128xf32, #tpu.memory_space<vmem>>) attributes {dimension_semantics = [#tpu.dimension_semantics<parallel>], iteration_bounds = array<i64: 1>, scalar_prefetch = 0 : i64, scratch_operands = 0 : i64, tpu.core_type = #tpu.core_type<tc>, window_params = [{transform_indices = @transform_0, window_bounds = array<i64: 16, 1>}, {pipeline_mode = #tpu.pipeline_mode<synchronous>, transform_indices = @transform_1, window_bounds = array<i64: 128, 128>}, {pipeline_mode = #tpu.pipeline_mode<synchronous>, transform_indices = @transform_2, window_bounds = array<i64: 8, 128>}, {transform_indices = @transform_3, window_bounds = array<i64: 16, 128>}]} {
    %0 = tpu.iota {dimensions = array<i32: 1>} : vector<16x128xi32>
    %c0 = arith.constant 0 : index
    %c0_0 = arith.constant 0 : index
    %1 = vector.load %arg1[%c0, %c0_0] : memref<16x1xi32, #tpu.memory_space<vmem>>, vector<16x1xi32>
    %2 = vector.broadcast %1 : vector<16x1xi32> to vector<16x128xi32>
    %3 = arith.cmpi eq, %2, %0 : vector<16x128xi32>
    %4 = arith.extui %3 : vector<16x128xi1> to vector<16x128xi32>
    %5 = arith.sitofp %4 : vector<16x128xi32> to vector<16x128xf32>
    %c0_1 = arith.constant 0 : index
    %c0_2 = arith.constant 0 : index
    %6 = vector.load %arg2[%c0_1, %c0_2] : memref<128x128xf32, #tpu.memory_space<vmem>>, vector<128x128xf32>
    %cst = arith.constant dense<0.000000e+00> : vector<16x128xf32>
    %7 = tpu.matmul %5, %6, %cst {dimension_numbers = #tpu.dot_dimension_numbers<[1], [0], [0], [1], [0, 0, 1, 1], [], []>} : vector<16x128xf32>, vector<128x128xf32>, vector<16x128xf32> -> vector<16x128xf32>
    %c0_3 = arith.constant 0 : index
    %c0_4 = arith.constant 0 : index
    %8 = vector.load %arg3[%c0_3, %c0_4] : memref<8x128xf32, #tpu.memory_space<vmem>>, vector<8x128xf32>
    %9 = tpu.concatenate %8, %8 in 0 : vector<8x128xf32>, vector<8x128xf32> -> vector<16x128xf32>
    %10 = arith.addf %7, %9 : vector<16x128xf32>
    %c0_5 = arith.constant 0 : index
    %c0_6 = arith.constant 0 : index
    %11 = vector.load %arg4[%c0_5, %c0_6] : memref<16x128xf32, #tpu.memory_space<vmem>>, vector<16x128xf32>
    tpu.vector_store %arg4[%c0_5, %c0_6], %10 {strides = array<i32>} : memref<16x128xf32, #tpu.memory_space<vmem>>, vector<16x128xf32>,
    return
  }
  func.func @transform_0(%arg0: i32) -> (i32, i32) {
    %c0_i32 = arith.constant 0 : i32
    %c0_i32_0 = arith.constant 0 : i32
    return %arg0, %c0_i32 : i32, i32
  }
  func.func @transform_1(%arg0: i32) -> (i32, i32) {
    %c0_i32 = arith.constant 0 : i32
    %c0_i32_0 = arith.constant 0 : i32
    %c0_i32_1 = arith.constant 0 : i32
    return %c0_i32, %c0_i32_0 : i32, i32
  }
  func.func @transform_2(%arg0: i32) -> (i32, i32) {
    %c0_i32 = arith.constant 0 : i32
    %c0_i32_0 = arith.constant 0 : i32
    %c0_i32_1 = arith.constant 0 : i32
    return %c0_i32, %c0_i32_0 : i32, i32
  }
  func.func @transform_3(%arg0: i32) -> (i32, i32) {
    %c0_i32 = arith.constant 0 : i32
    %c0_i32_0 = arith.constant 0 : i32
    return %arg0, %c0_i32 : i32, i32
  }
}

</mosaic_0001>

<bundles_post_ra>
// kernel: tpu_custom_call.1
= control target key start
LH: loop header
LB: loop body
LE: loop exit
PB: predicated region body
PF: predicated region fallthrough
CT: control target
= control target key end

     0   :  { %8 = vsyncpa [#allocation3], 0  ;;  %s234_s0 = inlined_call_operand.vmem [shape: s32[16,1], index: 0, kind: input, shape index: {}]   ;;  %s235_s1 = inlined_call_operand.hbm [shape: f32[128,128], index: 1, kind: input, shape index: {}]   ;;  %s236_s2 = inlined_call_operand.vmem [shape: f32[8,128], index: 2, kind: input, shape index: {}]   ;;  %s237_s3 = inlined_call_operand.hbm [shape: f32[16,128], index: 3, kind: output, shape index: {}]  }
   0x1   :  { %9 = vsyncpa [#allocation4], 0  ;;  %s16_s14 = sshll.u32 %s235_s1, 4  ;;  %s187_s15 = smov [#allocation2]   ;;  %s17_s14 = int_to_ptr.hbm [resolvable:$true] %s16_s14 }
   0x2   :  { %s18_s16 = sshll.u32 %s187_s15, 4  ;;  %s188_s17 = smov 128   ;;  %s19_s16 = int_to_ptr.vmem [resolvable:$true] %s18_s16 }
   0x3   :  { %s189_s18 = smov 8  }
   0x4   :  { %24 = dma.hbm_to_vmem [thread:$0]  %s17_s14, 2048, %s19_s16, [#allocation3], %s188_s17, %s188_s17, %s189_s18  }
   0x5   :  { %183 = dma.done.wait [#allocation3], 2048  }
   0x6   :  { %184 = vsyncadd [#allocation3], 4294965248  ;;  %v190_v0 = vmov 0   ;;  %v33_v1 = vld [vmem:[%s234_s0] sm:$0xff]  ;;  %v62_v2 = vld [vmem:[#allocation2 + $0x78] sm:$0xff]  ;;  %v31_v19 = vlaneseq  ;;  %v191_v22 = vmov 1.0  }
   0x7   :  { %134 = vset.pattern.permute.xlu0 %v190_v0  ;;  %64 = vmatpush.msra.mxu0 %v62_v2  ;;  %v61_v3 = vld [vmem:[#allocation2 + $0x70] sm:$0xff]  ;;  %v60_v4 = vld [vmem:[#allocation2 + $0x68] sm:$0xff]  ;;  %v59_v5 = vld [vmem:[#allocation2 + $0x60] sm:$0xff]  ;;  %s192_s23 = smov [#allocation5]   ;;  %s95_s27 = sshll.u32 %s237_s3, 4  ;;  %s96_s27 = int_to_ptr.hbm [resolvable:$true] %s95_s27 }
   0x8   :  { %36 = vperm.xlu0 %134, %v33_v1   ;;  %112 = vmatpush.msra.mxu1 %v62_v2  ;;  %v34_v6 = vld [vmem:[%s234_s0 + $0x8] sm:$0xff]  ;;  %v58_v7 = vld [vmem:[#allocation2 + $0x58] sm:$0xff]  ;;  %v57_v8 = vld [vmem:[#allocation2 + $0x50] sm:$0xff]  ;;  %v32_v20 = vand.u32 127, %v31_v19  ;;  %s93_s24 = sshll.u32 %s192_s23, 4  ;;  %s94_s24 = int_to_ptr.vmem [resolvable:$true] %s93_s24 }
   0x9   :  { %65 = vmatpush.msra.mxu0 %v61_v3  ;;  %v56_v9 = vld [vmem:[#allocation2 + $0x48] sm:$0xff]  ;;  %v55_v10 = vld [vmem:[#allocation2 + $0x40] sm:$0xff]  ;;  %v54_v11 = vld [vmem:[#allocation2 + $0x38] sm:$0xff] }
   0xa   :  { %113 = vmatpush.msra.mxu1 %v61_v3  ;;  %v53_v12 = vld [vmem:[#allocation2 + $0x30] sm:$0xff]  ;;  %v52_v13 = vld [vmem:[#allocation2 + $0x28] sm:$0xff]  ;;  %v51_v14 = vld [vmem:[#allocation2 + $0x20] sm:$0xff] }
   0xb   :  { %66 = vmatpush.msra.mxu0 %v60_v4  ;;  %v50_v15 = vld [vmem:[#allocation2 + $0x18] sm:$0xff]  ;;  %v49_v16 = vld [vmem:[#allocation2 + $0x10] sm:$0xff]  ;;  %v48_v17 = vld [vmem:[#allocation2 + $0x8] sm:$0xff] }
   0xc   :  { %114 = vmatpush.msra.mxu1 %v60_v4  ;;  %v47_v18 = vld [vmem:[#allocation2] sm:$0xff] }
   0xd   :  { %67 = vmatpush.msra.mxu0 %v59_v5  ;;  %v63_v24 = vld [vmem:[%s236_s2] sm:$0xff] }
   0xe   :  { %115 = vmatpush.msra.mxu1 %v59_v5 }
   0xf   :  { %68 = vmatpush.msra.mxu0 %v58_v7 }
  0x10   :  { %39 = vperm.xlu0 %134, %v34_v6   ;;  %116 = vmatpush.msra.mxu1 %v58_v7 }
  0x11   :  { %69 = vmatpush.msra.mxu0 %v57_v8 }
  0x12   :  { %117 = vmatpush.msra.mxu1 %v57_v8 }
  0x13   :  { %70 = vmatpush.msra.mxu0 %v56_v9 }
  0x14   :  { %118 = vmatpush.msra.mxu1 %v56_v9 }
  0x15   :  { %71 = vmatpush.msra.mxu0 %v55_v10 }
  0x16   :  { %119 = vmatpush.msra.mxu1 %v55_v10 }
  0x17   :  { %72 = vmatpush.msra.mxu0 %v54_v11 }
  0x18   :  { %120 = vmatpush.msra.mxu1 %v54_v11 }
  0x19   :  { %73 = vmatpush.msra.mxu0 %v53_v12 }
  0x1a   :  { %121 = vmatpush.msra.mxu1 %v53_v12 }
  0x1b   :  { %74 = vmatpush.msra.mxu0 %v52_v13 }
  0x1c   :  { %122 = vmatpush.msra.mxu1 %v52_v13 }
  0x1d   :  { %75 = vmatpush.msra.mxu0 %v51_v14 }
  0x1e   :  { %123 = vmatpush.msra.mxu1 %v51_v14 }
  0x1f   :  { %76 = vmatpush.msra.mxu0 %v50_v15 }
  0x20   :  { %124 = vmatpush.msra.mxu1 %v50_v15 }
  0x21   :  { %77 = vmatpush.msra.mxu0 %v49_v16 }
  0x22   :  { %125 = vmatpush.msra.mxu1 %v49_v16 }
  0x23   :  { %78 = vmatpush.msra.mxu0 %v48_v17 }
  0x24   :  { %126 = vmatpush.msra.mxu1 %v48_v17 }
  0x25   :  { %79 = vmatpush.msra.mxu0 %v47_v18 }
  0x26   :  { %127 = vmatpush.msra.mxu1 %v47_v18 }
  0x7a   :  { %v37_v21 = vpop.permute.xlu0 %36 }
  0x7b   :  { %vm41_vm0 = vcmp.eq.s32.totalorder %v37_v21, %v32_v20 }
  0x7c   :  { %110 = vmatmul.msk.f32.vlgmr.msra.gmra.mxu0 %vm41_vm0, %v191_v22 }
  0x82   :  { %v40_v23 = vpop.permute.xlu0 %39 }
  0x83   :  { %vm42_vm1 = vcmp.eq.s32.totalorder %v40_v23, %v32_v20 }
  0x84   :  { %111 = vmatmul.msk.f32.vlgmr.msra.gmra.mxu1 %vm42_vm1, %v191_v22 }
  0xf9   :  { %v81_v25 = vpop.f32.mrf.mxu0 }
  0xfa   :  { %v82_v26 = vadd.f32 %v81_v25, %v63_v24 }
  0xfc   :  { %87 = vst [vmem:[#allocation5] sm:$0xff] %v82_v26 }
 0x101   :  { %v84_v27 = vpop.f32.mrf.mxu1 }
 0x102   :  { %v85_v28 = vadd.f32 %v84_v27, %v63_v24 }
 0x104   :  { %88 = vst [vmem:[#allocation5 + $0x8] sm:$0xff] %v85_v28 }
 0x105   :  { %101 = dma.vmem_to_hbm [thread:$0]  %s94_s24, 256, %s96_s27, [#allocation4], %s188_s17, %s188_s17, %s189_s18  }
 0x106   :  { %185 = dma.done.wait [#allocation4], 256  }
 0x107   :  { %186 = vsyncadd [#allocation4], 4294967040 }
 0x108   :  { %106 = vsyncpa [#allocation3], 1 }
 0x109   :  { %107 = vsyncpa [#allocation4], 1 }

</bundles_post_ra>
